<compile_context>
chip_gen: v5e
topology: v5e:2x2
jax: 0.10.0
libtpu: 0.0.40
codegen_flags: <defaults>
</compile_context>

<pallas_src>
import jax
import jax.numpy as jnp
from jax.experimental import pallas as pl
from jax.experimental.pallas import tpu as pltpu


# ----------------------------------------------------------------------------
# Pallas kernel: one (batch, time-step) grid point of the fused TGCN sequence
# ----------------------------------------------------------------------------
def tgcn_seq_kernel(a_ref, x_ref, h0_ref, wcl_ref, wl2zr_ref, wl2h_ref, b_ref,
                    o_ref, h_carry):
    # a_ref     : (N, N)         cd    normalized adjacency (VMEM-resident)
    # x_ref     : (1, N, Fin)    cd    X_t for this (batch, step)  (streamed)
    # h0_ref    : (1, N, Fout)   f32   initial hidden state for this batch
    # wcl_ref   : (Fin, 3*Fout)  f32   [Wc_z@Wl1_z | Wc_r@Wl1_r | Wc_h@Wl1_h]
    # wl2zr_ref : (Fout, 2*Fout) cd    [Wl2_z | Wl2_r]
    # wl2h_ref  : (Fout, Fout)   cd    Wl2_h
    # b_ref     : (1, 3*Fout)    f32   bl_i + bc_i @ Wl1_i   (post-propagation bias)
    # o_ref     : (1, N, Fout)   f32   H_t output for this (batch, step)
    # h_carry   : (N, Fout)      f32   recurrent carry, persists along the t axis
    t = pl.program_id(1)
    fin = wcl_ref.shape[0]
    f = wl2h_ref.shape[0]
    cd = a_ref.dtype

    @pl.when(t == 0)
    def _():
        h_carry[...] = h0_ref[0]

    x32 = x_ref[0].astype(jnp.float32)      # (N, Fin)
    h = h_carry[...]                        # (N, Fout)  float32 recurrent state

    # ---- X-side contraction (K = Fin).  For tiny Fin do it as Fin VPU
    #      broadcast-FMAs in f32 (MXU stays free for the N x N matmul);
    #      otherwise a single wide dot over all three gates.
    if fin <= 8:
        w = wcl_ref[...]                    # (Fin, 3*Fout) f32
        xw = x32[:, 0:1] * w[0:1, :]
        for i in range(1, fin):             # compile-time unrolled (Fin small)
            xw = xw + x32[:, i:i + 1] * w[i:i + 1, :]
    else:
        xw = jnp.dot(x32, wcl_ref[...], preferred_element_type=jnp.float32)

    # ---- GCN propagation for all three gates in ONE MXU matmul (3*Fout lanes).
    #      Fused bias added after propagation (matches conv + linear semantics).
    s = jnp.dot(a_ref[...], xw.astype(cd),
                preferred_element_type=jnp.float32) + b_ref[...]

    # ---- H-side contributions; state stays f32, cast only at the dot inputs.
    h_cd = h.astype(cd)
    hw = jnp.dot(h_cd, wl2zr_ref[...], preferred_element_type=jnp.float32)

    z = jax.nn.sigmoid(s[:, :f] + hw[:, :f])
    r = jax.nn.sigmoid(s[:, f:2 * f] + hw[:, f:2 * f])
    hr = (h * r).astype(cd)
    h_tilde = jnp.tanh(
        s[:, 2 * f:] + jnp.dot(hr, wl2h_ref[...],
                               preferred_element_type=jnp.float32))
    h_new = z * h + (1.0 - z) * h_tilde

    h_carry[...] = h_new
    o_ref[0] = h_new.astype(o_ref.dtype)


# ----------------------------------------------------------------------------
# Wrapper: parameter fusion + single fused pallas_call over (batch, time)
# ----------------------------------------------------------------------------
def tgcn2_forward_sequence(A_hat, X_seq, H0, Wc, bc, Wl1, Wl2, bl,
                           *, compute_dtype=jnp.float32):
    """Run the TGCN2 cell over a whole sequence in one fused kernel.

    A_hat : (N, N)           normalized dense adjacency
    X_seq : (B, T, N, Fin)   node features per step
    H0    : (B, N, Fout)     initial hidden state (or None -> zeros)
    Wc    : (3, Fin, Fout)   GCNConv weights (z, r, h), pre-transposed
    bc    : (3, 1, Fout)     GCNConv biases
    Wl1   : (3, Fout, Fout)  Linear half acting on the conv output
    Wl2   : (3, Fout, Fout)  Linear half acting on H
    bl    : (3, 1, Fout)     Linear biases
    compute_dtype: dtype fed to the MXU.  bfloat16 is fine on v5e/v6e/v7x
                   (only dot inputs are cast; recurrent state and gate
                   elementwise math stay float32).
    Returns (B, T, N, Fout): hidden state after every step.
    """
    B, T, N, Fin = X_seq.shape
    Fout = Wc.shape[-1]
    if H0 is None:
        H0 = jnp.zeros((B, N, Fout), jnp.float32)

    # ---- wrapper-side parameter fusion (constant-foldable) ----
    Wcl3 = jnp.concatenate([Wc[i] @ Wl1[i] for i in range(3)],
                           axis=1).astype(jnp.float32)              # (Fin, 3F)
    b3 = jnp.concatenate([bl[i] + bc[i] @ Wl1[i] for i in range(3)],
                         axis=1).astype(jnp.float32)                # (1, 3F)
    cd = compute_dtype
    Wl2zr = jnp.concatenate([Wl2[0], Wl2[1]], axis=1).astype(cd)    # (F, 2F)
    Wl2h = Wl2[2].astype(cd)                                        # (F, F)

    A_c = A_hat.astype(cd)
    Xf = X_seq.reshape(B * T, N, Fin).astype(cd)   # streamed per (b, t)
    H0f = H0.astype(jnp.float32)

    out = pl.pallas_call(
        tgcn_seq_kernel,
        out_shape=jax.ShapeDtypeStruct((B * T, N, Fout), jnp.float32),
        grid_spec=pltpu.PrefetchScalarGridSpec(
            num_scalar_prefetch=0,
            grid=(B, T),                            # batch parallel, time sequential
            in_specs=[
                pl.BlockSpec((N, N), lambda b, t: (0, 0)),             # A (resident)
                pl.BlockSpec((1, N, Fin), lambda b, t: (b * T + t, 0, 0)),  # X_t
                pl.BlockSpec((1, N, Fout), lambda b, t: (b, 0, 0)),    # H0 (per batch)
                pl.BlockSpec((Fin, 3 * Fout), lambda b, t: (0, 0)),    # Wcl3
                pl.BlockSpec((Fout, 2 * Fout), lambda b, t: (0, 0)),   # Wl2zr
                pl.BlockSpec((Fout, Fout), lambda b, t: (0, 0)),       # Wl2h
                pl.BlockSpec((1, 3 * Fout), lambda b, t: (0, 0)),      # fused bias
            ],
            out_specs=pl.BlockSpec((1, N, Fout), lambda b, t: (b * T + t, 0, 0)),
            scratch_shapes=[pltpu.VMEM((N, Fout), jnp.float32)],       # H carry (f32)
        ),
        compiler_params=pltpu.CompilerParams(
            dimension_semantics=("parallel", "arbitrary")),
        # NOTE: output H_seq has a different shape than H0, so
        # input_output_aliases cannot be used here; for a final-state-only
        # variant alias H0 -> output to avoid the extra HBM buffer.
    )(A_c, Xf, H0f, Wcl3, Wl2zr, Wl2h, b3)
    return out.reshape(B, T, N, Fout)


def tgcn2_forward(A_hat, X, H, Wc, bc, Wl1, Wl2, bl,
                  *, compute_dtype=jnp.float32):
    """Single TGCN2 cell step (exact module forward): X (B, N, Fin) -> (B, N, Fout)."""
    out = tgcn2_forward_sequence(A_hat, X[:, None], H, Wc, bc, Wl1, Wl2, bl,
                                 compute_dtype=compute_dtype)
    return out[:, 0]


# ----------------------------------------------------------------------------
# Glue: dense GCN normalization (PyG gcn_norm semantics with add_self_loops)
# ----------------------------------------------------------------------------
def gcn_norm_dense(edge_index, edge_weight, num_nodes, improved=False):
    fill = 2.0 if improved else 1.0
    src, dst = edge_index[0], edge_index[1]
    A = jnp.zeros((num_nodes, num_nodes), jnp.float32)
    A = A.at[dst, src].add(edge_weight)          # aggregate at the target node
    A = A + fill * jnp.eye(num_nodes, dtype=jnp.float32)
    deg = A.sum(axis=1)
    dinv = jnp.where(deg > 0, 1.0 / jnp.sqrt(deg), 0.0)
    return dinv[:, None] * A * dinv[None, :]


# ----------------------------------------------------------------------------
# Pure-JAX reference (original, unfused formulation) for correctness checks
# ----------------------------------------------------------------------------
def tgcn2_reference(A_hat, X, H, Wc, bc, Wl1, Wl2, bl):
    def gcn(i):
        return jnp.einsum("nm,bmf->bnf", A_hat, X @ Wc[i]) + bc[i]

    Z = jax.nn.sigmoid(gcn(0) @ Wl1[0] + H @ Wl2[0] + bl[0])
    R = jax.nn.sigmoid(gcn(1) @ Wl1[1] + H @ Wl2[1] + bl[1])
    Ht = jnp.tanh(gcn(2) @ Wl1[2] + (H * R) @ Wl2[2] + bl[2])
    return Z * H + (1.0 - Z) * Ht


def tgcn2_reference_sequence(A_hat, X_seq, H0, Wc, bc, Wl1, Wl2, bl):
    H = H0
    outs = []
    for t in range(X_seq.shape[1]):
        H = tgcn2_reference(A_hat, X_seq[:, t], H, Wc, bc, Wl1, Wl2, bl)
        outs.append(H)
    return jnp.stack(outs, axis=1)


# ----------------------------------------------------------------------------
# Main
# ----------------------------------------------------------------------------
if __name__ == "__main__":
    B, T, N, Fin, Fout = 2, 8, 16, 4, 32

    key = jax.random.PRNGKey(0)
    k_x, k_h, k_w, k_ew = jax.random.split(key, 4)

    X_seq = jax.random.normal(k_x, (B, T, N, Fin), jnp.float32)
    H0 = jax.random.normal(k_h, (B, N, Fout), jnp.float32)

    # Deterministic ring graph (both directions) with random positive weights.
    src = jnp.arange(N, dtype=jnp.int32)
    dst = (src + 1) % N
    edge_index = jnp.stack([jnp.concatenate([src, dst]),
                            jnp.concatenate([dst, src])], axis=0)   # (2, 2N)
    edge_weight = jax.random.uniform(k_ew, (2 * N,), jnp.float32,
                                     minval=0.5, maxval=1.5)
    A_hat = gcn_norm_dense(edge_index, edge_weight, N, improved=False)

    # Deterministic parameters (shapes from the module __init__):
    # GCNConv lin weight (Fout, Fin) stored transposed; Linear(2F, F) split.
    kws = jax.random.split(k_w, 9)
    Wc = jnp.stack([0.1 * jax.random.normal(kws[i], (Fin, Fout), jnp.float32)
                    for i in range(3)])                                   # (3,Fin,F)
    bc = jnp.stack([0.01 * jax.random.normal(kws[3 + i], (1, Fout), jnp.float32)
                    for i in range(3)])                                   # (3,1,F)
    Wl_full = [0.1 * jax.random.normal(kws[6 + i], (Fout, 2 * Fout), jnp.float32)
               for i in range(3)]
    Wl1 = jnp.stack([w[:, :Fout].T for w in Wl_full])                     # (3,F,F)
    Wl2 = jnp.stack([w[:, Fout:].T for w in Wl_full])                     # (3,F,F)
    bl = jnp.stack([0.01 * jnp.ones((1, Fout), jnp.float32) * (i + 1)
                    for i in range(3)])                                   # (3,1,F)

    # Reference (unfused, pure JAX).
    H_seq_ref = tgcn2_reference_sequence(A_hat, X_seq, H0, Wc, bc, Wl1, Wl2, bl)

    # Fused-sequence kernel, float32 path (exact module semantics).
    H_seq = tgcn2_forward_sequence(A_hat, X_seq, H0, Wc, bc, Wl1, Wl2, bl)
    H_seq = jax.block_until_ready(H_seq)
    assert H_seq.shape == (B, T, N, Fout)
    assert jnp.allclose(H_seq, H_seq_ref, atol=1e-3, rtol=1e-3), \
        "f32 sequence mismatch vs reference"

    # Single cell step (matches the module forward exactly).
    H1 = tgcn2_forward(A_hat, X_seq[:, 0], H0, Wc, bc, Wl1, Wl2, bl)
    H1 = jax.block_until_ready(H1)
    assert H1.shape == (B, N, Fout)
    assert jnp.allclose(H1, H_seq_ref[:, 0], atol=1e-3, rtol=1e-3), \
        "f32 single-step mismatch vs reference"

    # bf16 matmul path (valid on v5e/v6e/v7x: bf16 MXU; gate math stays f32).
    H_seq_bf16 = tgcn2_forward_sequence(A_hat, X_seq, H0, Wc, bc, Wl1, Wl2, bl,
                                        compute_dtype=jnp.bfloat16)
    H_seq_bf16 = jax.block_until_ready(H_seq_bf16)
    assert jnp.allclose(H_seq_bf16, H_seq_ref, atol=1e-1, rtol=1e-1), \
        "bf16 sequence mismatch vs reference"

    print("KERNEL_OK")
</pallas_src>

<mosaic_0001>
module attributes {stable_mosaic.version = 11 : i64} {
  func.func @tgcn_seq_kernel(%arg0: i32, %arg1: i32, %arg2: memref<16x16xf32, #tpu.memory_space<vmem>>, %arg3: memref<1x16x4xf32, #tpu.memory_space<vmem>>, %arg4: memref<1x16x32xf32, #tpu.memory_space<vmem>>, %arg5: memref<4x96xf32, #tpu.memory_space<vmem>>, %arg6: memref<32x64xf32, #tpu.memory_space<vmem>>, %arg7: memref<32x32xf32, #tpu.memory_space<vmem>>, %arg8: memref<1x96xf32, #tpu.memory_space<vmem>>, %arg9: memref<1x16x32xf32, #tpu.memory_space<vmem>>, %arg10: memref<16x32xf32, #tpu.memory_space<vmem>>) attributes {dimension_semantics = [#tpu.dimension_semantics<parallel>, #tpu.dimension_semantics<arbitrary>], iteration_bounds = array<i64: 2, 8>, scalar_prefetch = 0 : i64, scratch_operands = 1 : i64, tpu.core_type = #tpu.core_type<tc>, window_params = [{pipeline_mode = #tpu.pipeline_mode<synchronous>, transform_indices = @transform_0, window_bounds = array<i64: 16, 16>}, {transform_indices = @transform_1, window_bounds = array<i64: 1, 16, 4>}, {transform_indices = @transform_2, window_bounds = array<i64: 1, 16, 32>}, {pipeline_mode = #tpu.pipeline_mode<synchronous>, transform_indices = @transform_3, window_bounds = array<i64: 4, 96>}, {pipeline_mode = #tpu.pipeline_mode<synchronous>, transform_indices = @transform_4, window_bounds = array<i64: 32, 64>}, {pipeline_mode = #tpu.pipeline_mode<synchronous>, transform_indices = @transform_5, window_bounds = array<i64: 32, 32>}, {pipeline_mode = #tpu.pipeline_mode<synchronous>, transform_indices = @transform_6, window_bounds = array<i64: 1, 96>}, {transform_indices = @transform_7, window_bounds = array<i64: 1, 16, 32>}]} {
    %c0_i32 = arith.constant 0 : i32
    %0 = arith.cmpi eq, %arg1, %c0_i32 : i32
    %1 = arith.extui %0 : i1 to i32
    %c0_i32_0 = arith.constant 0 : i32
    %2 = arith.cmpi ne, %1, %c0_i32_0 : i32
    scf.if %2 {
      %c0_25 = arith.constant 0 : index
      %c0_26 = arith.constant 0 : index
      %c0_27 = arith.constant 0 : index
      %68 = vector.load %arg4[%c0_25, %c0_26, %c0_27] : memref<1x16x32xf32, #tpu.memory_space<vmem>>, vector<1x16x32xf32>
      %69 = vector.shape_cast %68 : vector<1x16x32xf32> to vector<16x32xf32>
      %c0_28 = arith.constant 0 : index
      %c0_29 = arith.constant 0 : index
      %70 = vector.load %arg10[%c0_28, %c0_29] : memref<16x32xf32, #tpu.memory_space<vmem>>, vector<16x32xf32>
      tpu.vector_store %arg10[%c0_28, %c0_29], %69 {strides = array<i32>} : memref<16x32xf32, #tpu.memory_space<vmem>>, vector<16x32xf32>,
    } else {
    }
    %c0 = arith.constant 0 : index
    %c0_1 = arith.constant 0 : index
    %c0_2 = arith.constant 0 : index
    %3 = vector.load %arg3[%c0, %c0_1, %c0_2] : memref<1x16x4xf32, #tpu.memory_space<vmem>>, vector<1x16x4xf32>
    %4 = vector.shape_cast %3 : vector<1x16x4xf32> to vector<16x4xf32>
    %c0_3 = arith.constant 0 : index
    %c0_4 = arith.constant 0 : index
    %5 = vector.load %arg10[%c0_3, %c0_4] : memref<16x32xf32, #tpu.memory_space<vmem>>, vector<16x32xf32>
    %c0_5 = arith.constant 0 : index
    %c0_6 = arith.constant 0 : index
    %6 = vector.load %arg5[%c0_5, %c0_6] : memref<4x96xf32, #tpu.memory_space<vmem>>, vector<4x96xf32>
    %7 = vector.extract_strided_slice %4 {offsets = [0, 0], sizes = [16, 1], strides = [1, 1]} : vector<16x4xf32> to vector<16x1xf32>
    %8 = vector.extract_strided_slice %6 {offsets = [0, 0], sizes = [1, 96], strides = [1, 1]} : vector<4x96xf32> to vector<1x96xf32>
    %9 = vector.broadcast %7 : vector<16x1xf32> to vector<16x96xf32>
    %10 = vector.broadcast %8 : vector<1x96xf32> to vector<16x96xf32>
    %11 = arith.mulf %9, %10 : vector<16x96xf32>
    %12 = vector.extract_strided_slice %4 {offsets = [0, 1], sizes = [16, 1], strides = [1, 1]} : vector<16x4xf32> to vector<16x1xf32>
    %13 = vector.extract_strided_slice %6 {offsets = [1, 0], sizes = [1, 96], strides = [1, 1]} : vector<4x96xf32> to vector<1x96xf32>
    %14 = vector.broadcast %12 : vector<16x1xf32> to vector<16x96xf32>
    %15 = vector.broadcast %13 : vector<1x96xf32> to vector<16x96xf32>
    %16 = arith.mulf %14, %15 : vector<16x96xf32>
    %17 = arith.addf %11, %16 : vector<16x96xf32>
    %18 = vector.extract_strided_slice %4 {offsets = [0, 2], sizes = [16, 1], strides = [1, 1]} : vector<16x4xf32> to vector<16x1xf32>
    %19 = vector.extract_strided_slice %6 {offsets = [2, 0], sizes = [1, 96], strides = [1, 1]} : vector<4x96xf32> to vector<1x96xf32>
    %20 = vector.broadcast %18 : vector<16x1xf32> to vector<16x96xf32>
    %21 = vector.broadcast %19 : vector<1x96xf32> to vector<16x96xf32>
    %22 = arith.mulf %20, %21 : vector<16x96xf32>
    %23 = arith.addf %17, %22 : vector<16x96xf32>
    %24 = vector.extract_strided_slice %4 {offsets = [0, 3], sizes = [16, 1], strides = [1, 1]} : vector<16x4xf32> to vector<16x1xf32>
    %25 = vector.extract_strided_slice %6 {offsets = [3, 0], sizes = [1, 96], strides = [1, 1]} : vector<4x96xf32> to vector<1x96xf32>
    %26 = vector.broadcast %24 : vector<16x1xf32> to vector<16x96xf32>
    %27 = vector.broadcast %25 : vector<1x96xf32> to vector<16x96xf32>
    %28 = arith.mulf %26, %27 : vector<16x96xf32>
    %29 = arith.addf %23, %28 : vector<16x96xf32>
    %c0_7 = arith.constant 0 : index
    %c0_8 = arith.constant 0 : index
    %30 = vector.load %arg2[%c0_7, %c0_8] : memref<16x16xf32, #tpu.memory_space<vmem>>, vector<16x16xf32>
    %cst = arith.constant dense<0.000000e+00> : vector<16x96xf32>
    %31 = tpu.matmul %30, %29, %cst {dimension_numbers = #tpu.dot_dimension_numbers<[1], [0], [0], [1], [0, 0, 1, 1], [], []>} : vector<16x16xf32>, vector<16x96xf32>, vector<16x96xf32> -> vector<16x96xf32>
    %c0_9 = arith.constant 0 : index
    %c0_10 = arith.constant 0 : index
    %32 = vector.load %arg8[%c0_9, %c0_10] : memref<1x96xf32, #tpu.memory_space<vmem>>, vector<1x96xf32>
    %33 = vector.broadcast %32 : vector<1x96xf32> to vector<16x96xf32>
    %34 = arith.addf %31, %33 : vector<16x96xf32>
    %c0_11 = arith.constant 0 : index
    %c0_12 = arith.constant 0 : index
    %35 = vector.load %arg6[%c0_11, %c0_12] : memref<32x64xf32, #tpu.memory_space<vmem>>, vector<32x64xf32>
    %cst_13 = arith.constant dense<0.000000e+00> : vector<16x64xf32>
    %36 = tpu.matmul %5, %35, %cst_13 {dimension_numbers = #tpu.dot_dimension_numbers<[1], [0], [0], [1], [0, 0, 1, 1], [], []>} : vector<16x32xf32>, vector<32x64xf32>, vector<16x64xf32> -> vector<16x64xf32>
    %37 = vector.extract_strided_slice %34 {offsets = [0, 0], sizes = [16, 32], strides = [1, 1]} : vector<16x96xf32> to vector<16x32xf32>
    %38 = vector.extract_strided_slice %36 {offsets = [0, 0], sizes = [16, 32], strides = [1, 1]} : vector<16x64xf32> to vector<16x32xf32>
    %39 = arith.addf %37, %38 : vector<16x32xf32>
    %40 = arith.negf %39 : vector<16x32xf32>
    %41 = math.exp %40 : vector<16x32xf32>
    %cst_14 = arith.constant 1.000000e+00 : f32
    %42 = vector.broadcast %cst_14 : f32 to vector<16x32xf32>
    %43 = arith.addf %42, %41 : vector<16x32xf32>
    %44 = arith.divf %42, %43 : vector<16x32xf32>
    %45 = vector.extract_strided_slice %34 {offsets = [0, 32], sizes = [16, 32], strides = [1, 1]} : vector<16x96xf32> to vector<16x32xf32>
    %46 = vector.extract_strided_slice %36 {offsets = [0, 32], sizes = [16, 32], strides = [1, 1]} : vector<16x64xf32> to vector<16x32xf32>
    %47 = arith.addf %45, %46 : vector<16x32xf32>
    %48 = arith.negf %47 : vector<16x32xf32>
    %49 = math.exp %48 : vector<16x32xf32>
    %cst_15 = arith.constant 1.000000e+00 : f32
    %50 = vector.broadcast %cst_15 : f32 to vector<16x32xf32>
    %51 = arith.addf %50, %49 : vector<16x32xf32>
    %52 = arith.divf %50, %51 : vector<16x32xf32>
    %53 = arith.mulf %5, %52 : vector<16x32xf32>
    %54 = vector.extract_strided_slice %34 {offsets = [0, 64], sizes = [16, 32], strides = [1, 1]} : vector<16x96xf32> to vector<16x32xf32>
    %c0_16 = arith.constant 0 : index
    %c0_17 = arith.constant 0 : index
    %55 = vector.load %arg7[%c0_16, %c0_17] : memref<32x32xf32, #tpu.memory_space<vmem>>, vector<32x32xf32>
    %cst_18 = arith.constant dense<0.000000e+00> : vector<16x32xf32>
    %56 = tpu.matmul %53, %55, %cst_18 {dimension_numbers = #tpu.dot_dimension_numbers<[1], [0], [0], [1], [0, 0, 1, 1], [], []>} : vector<16x32xf32>, vector<32x32xf32>, vector<16x32xf32> -> vector<16x32xf32>
    %57 = arith.addf %54, %56 : vector<16x32xf32>
    %58 = math.tanh %57 : vector<16x32xf32>
    %59 = arith.mulf %44, %5 : vector<16x32xf32>
    %cst_19 = arith.constant 1.000000e+00 : f32
    %60 = vector.broadcast %cst_19 : f32 to vector<16x32xf32>
    %61 = arith.subf %60, %44 : vector<16x32xf32>
    %62 = arith.mulf %61, %58 : vector<16x32xf32>
    %63 = arith.addf %59, %62 : vector<16x32xf32>
    %c0_20 = arith.constant 0 : index
    %c0_21 = arith.constant 0 : index
    %64 = vector.load %arg10[%c0_20, %c0_21] : memref<16x32xf32, #tpu.memory_space<vmem>>, vector<16x32xf32>
    tpu.vector_store %arg10[%c0_20, %c0_21], %63 {strides = array<i32>} : memref<16x32xf32, #tpu.memory_space<vmem>>, vector<16x32xf32>,
    %c0_22 = arith.constant 0 : index
    %c0_23 = arith.constant 0 : index
    %c0_24 = arith.constant 0 : index
    %65 = vector.load %arg9[%c0_22, %c0_23, %c0_24] : memref<1x16x32xf32, #tpu.memory_space<vmem>>, vector<1x16x32xf32>
    %66 = vector.shape_cast %65 : vector<1x16x32xf32> to vector<16x32xf32>
    %67 = vector.shape_cast %63 : vector<16x32xf32> to vector<1x16x32xf32>
    tpu.vector_store %arg9[%c0_22, %c0_23, %c0_24], %67 {strides = array<i32>} : memref<1x16x32xf32, #tpu.memory_space<vmem>>, vector<1x16x32xf32>,
    return
  }
  func.func @transform_0(%arg0: i32, %arg1: i32) -> (i32, i32) {
    %c0_i32 = arith.constant 0 : i32
    %c0_i32_0 = arith.constant 0 : i32
    %c0_i32_1 = arith.constant 0 : i32
    return %c0_i32, %c0_i32_0 : i32, i32
  }
  func.func @transform_1(%arg0: i32, %arg1: i32) -> (i32, i32, i32) {
    %c8_i32 = arith.constant 8 : i32
    %0 = arith.muli %arg0, %c8_i32 : i32
    %1 = arith.addi %0, %arg1 : i32
    %c0_i32 = arith.constant 0 : i32
    %c0_i32_0 = arith.constant 0 : i32
    %c0_i32_1 = arith.constant 0 : i32
    return %1, %c0_i32, %c0_i32_0 : i32, i32, i32
  }
  func.func @transform_2(%arg0: i32, %arg1: i32) -> (i32, i32, i32) {
    %c0_i32 = arith.constant 0 : i32
    %c0_i32_0 = arith.constant 0 : i32
    %c0_i32_1 = arith.constant 0 : i32
    return %arg0, %c0_i32, %c0_i32_0 : i32, i32, i32
  }
  func.func @transform_3(%arg0: i32, %arg1: i32) -> (i32, i32) {
    %c0_i32 = arith.constant 0 : i32
    %c0_i32_0 = arith.constant 0 : i32
    %c0_i32_1 = arith.constant 0 : i32
    return %c0_i32, %c0_i32_0 : i32, i32
  }
  func.func @transform_4(%arg0: i32, %arg1: i32) -> (i32, i32) {
    %c0_i32 = arith.constant 0 : i32
    %c0_i32_0 = arith.constant 0 : i32
    %c0_i32_1 = arith.constant 0 : i32
    return %c0_i32, %c0_i32_0 : i32, i32
  }
  func.func @transform_5(%arg0: i32, %arg1: i32) -> (i32, i32) {
    %c0_i32 = arith.constant 0 : i32
    %c0_i32_0 = arith.constant 0 : i32
    %c0_i32_1 = arith.constant 0 : i32
    return %c0_i32, %c0_i32_0 : i32, i32
  }
  func.func @transform_6(%arg0: i32, %arg1: i32) -> (i32, i32) {
    %c0_i32 = arith.constant 0 : i32
    %c0_i32_0 = arith.constant 0 : i32
    %c0_i32_1 = arith.constant 0 : i32
    return %c0_i32, %c0_i32_0 : i32, i32
  }
  func.func @transform_7(%arg0: i32, %arg1: i32) -> (i32, i32, i32) {
    %c8_i32 = arith.constant 8 : i32
    %0 = arith.muli %arg0, %c8_i32 : i32
    %1 = arith.addi %0, %arg1 : i32
    %c0_i32 = arith.constant 0 : i32
    %c0_i32_0 = arith.constant 0 : i32
    %c0_i32_1 = arith.constant 0 : i32
    return %1, %c0_i32, %c0_i32_0 : i32, i32, i32
  }
}

</mosaic_0001>

<bundles_post_ra>
// kernel: tpu_custom_call.1
= control target key start
LH: loop header
LB: loop body
LE: loop exit
PB: predicated region body
PF: predicated region fallthrough
CT: control target
= control target key end

     0   :  { %12 = vsyncpa [#allocation4], 0  ;;  %s1166_s0 = inlined_call_operand.vmem [shape: f32[16,16], index: 0, kind: input, shape index: {}]   ;;  %s1167_s1 = inlined_call_operand.vmem [shape: f32[16,16,4], index: 1, kind: input, shape index: {}]   ;;  %s1168_s2 = inlined_call_operand.vmem [shape: f32[2,16,32], index: 2, kind: input, shape index: {}]   ;;  %s1169_s3 = inlined_call_operand.vmem [shape: f32[4,96], index: 3, kind: input, shape index: {}]   ;;  %s1170_s4 = inlined_call_operand.vmem [shape: f32[32,64], index: 4, kind: input, shape index: {}]   ;;  %s1171_s5 = inlined_call_operand.vmem [shape: f32[32,32], index: 5, kind: input, shape index: {}]   ;;  %s1172_s6 = inlined_call_operand.vmem [shape: f32[1,96], index: 6, kind: input, shape index: {}]   ;;  %s1173_s7 = inlined_call_operand.hbm [shape: f32[16,16,32], index: 7, kind: output, shape index: {}]  }
   0x1   :  { %14 = vsyncpa [#allocation4 + $0x1], 0  ;;  %s966_s24 = smov 0   ;;  %s968_s25 = smov 0  }
   0x2   :  { %s970_s26 = smov 0   ;;  %s972_s27 = smov 0  }
   0x3   :  { %s974_s28 = smov 0   ;;  %s976_s29 = smov 0  }
   0x4   :  { %s978_s30 = smov 0   ;;  %s980_s8 = smov 0  }
   0x5 LB: > { %1178 = sst [smem:[#allocation6_spill]] %s908_s29  ;;  %s685_s9 = sadd.s32 4294967295, %s916_s8   ;;  %s916_s8 = sphi %s980_s8, %s20_s8   ;;  %s912_s30 = sphi %s978_s30, %s1187_s30   ;;  %s908_s29 = sphi %s976_s29, %s1186_s29   ;;  %s904_s28 = sphi %s974_s28, %s1185_s28   ;;  %s900_s27 = sphi %s972_s27, %s1184_s27   ;;  %s896_s26 = sphi %s970_s26, %s1190_s26   ;;  %s892_s25 = sphi %s968_s25, %s1189_s25   ;;  %s888_s24 = sphi %s966_s24, %s1188_s24  }
   0x6   : > { %1179 = sst [smem:[#allocation7_spill]] %s912_s30  ;;  %s29_s10 = sadd.s32 1, %s908_s29 }
   0x7   : > { %s32_s11 = sadd.s32 1, %s912_s30  ;;  %p30_p0 = scmp.ge.s32.totalorder %s29_s10, 8 }
   0x8   : > { %s689_s12 = sshll.u32 %s912_s30, 3  ;;  %s686_s13 = sadd.s32 4294967294, %s916_s8  }
   0x9   : > { %s198_s14 = sadd.s32 %s908_s29, %s689_s12  ;;  %s1192_s10 = smov (%p30_p0, %s29_s10), 0 }
   0xa   : > { %1180 = sst [smem:[#allocation8_spill]] %s1192_s10  ;;  %s1194_s11 = smov (!%p30_p0, %s32_s11), %s912_s30 }
   0xb   : > { %p214_p1 = scmp.ne.s32.totalorder %s896_s26, %s892_s25  ;;  %p215_p2 = scmp.eq.s32.totalorder %s685_s9, 15 }
   0xc   : > { %p34_p3 = scmp.ge.s32.totalorder %s1194_s11, 2  ;;  %p220_p4 = scmp.ne.s32.totalorder %s892_s25, %s888_s24 }
   0xd   : > { %p1019_p5 = por %p215_p2, %p214_p1  ;;  %p221_p6 = scmp.eq.s32.totalorder %s686_s13, 15 }
   0xe   : > { %s1196_s11 = smov (%p34_p3, %s1194_s11), 0  ;;  %p693_p8 = scmp.ge.s32.totalorder %s916_s8, 1 }
   0xf   : > { %1182 = sst [smem:[#allocation9_spill]] %s1196_s11  ;;  %p1025_p7 = por %p221_p6, %p220_p4 }
  0x10   : > { %s690_s17 = sshll.u32 %s1196_s11, 3  ;;  %p274_p9 = scmp.lt.s32.totalorder %s916_s8, 17 }
  0x11   : > { %s200_s18 = sadd.s32 %s690_s17, %s1192_s10  ;;  %s204_s19 = sadd.s32 1, %s896_s26 }
  0x12   : > { %s201_s20 = ssub.s32 %s198_s14, %s200_s18  ;;  %p275_p10 = pnand %p693_p8, %p274_p9 }
  0x13   : > { %p202_p11 = scmp.eq.s32.totalorder %s201_s20, 0  ;;  %s310_s22 = sand.u32 (!%p275_p10), 1, %s892_s25  }
  0x14   : > { %278 = sbr.rel (%p275_p10) target bundleno = 815 (0x32f), region = 48  ;;  %s695_s23 = sshll.u32 (!%p275_p10), %s904_s28, 3 }
  0x15   : > { %s1035_s21 = scalar_select %p202_p11, %s896_s26, %s204_s19  }
  0x16   : > { %s694_s9 = sshll.u32 (!%p275_p10), %s310_s22, 4  ;;  %s1042_s12 = sadd.s32 (!%p275_p10), %s900_s27, %s695_s23 }
  0x17   : > { %p315_p12 = scmp.lt.s32.totalorder (!%p275_p10), %s1042_s12, 15  ;;  %p322_p13 = scmp.lt.s32.totalorder (!%p275_p10), %s904_s28, 1 }
  0x18   : > { %s1054_s29 = scalar_lea.vmem (!%p275_p10), [#allocation3], %s694_s9  ;;  %p700_p0 = scmp.ne.s32.totalorder (!%p275_p10), %s900_s27, 0 }
  0x19   : > { %s316_s13 = scalar_select %p315_p12, %s1042_s12, 15 }
  0x1a   : > { %s1198_s28 = smov (!%p322_p13, %s904_s28), 1  ;;  %332 = sbr.rel (%p700_p0) target bundleno = 34 (0x22), region = 52 }
  0x1b   : > { %s715_s14 = sshll.u32 %s316_s13, 4  ;;  %s716_s20 = sshll.u32 %s1198_s28, 4 }
  0x1c   : > { %s319_s19 = scalar_lea.vmem %s1167_s1, %s715_s14  ;;  %s326_s30 = scalar_lea.vmem %s1168_s2, %s716_s20 }
  0x1f   : > { %v333_v0 = vld [vmem:[%s326_s30] sm:$0xff]  ;;  %vm335_vm0 = vcmask 261120   ;;  %v334_v1 = vld [vmem:[%s326_s30 + $0x8] sm:$0xff] }
  0x20   : > { %336 = vst.msk [vmem:[#allocation2] sm:$0xff] %vm335_vm0, %v333_v0 }
  0x21   : > { %337 = vst.msk [vmem:[#allocation2 + $0x8] sm:$0xff] %vm335_vm0, %v334_v1 }
  0x22 PF: > { %v339_v2 = vld [vmem:[%s319_s19 + $0x8] sm:$0xff]  ;;  %v338_v3 = vld [vmem:[%s319_s19] sm:$0xff]  ;;  %v918_v4 = vmov 0   ;;  %v919_v5 = vmov 2   ;;  %v920_v6 = vmov 1   ;;  %v921_v7 = vmov 3  }
  0x23   : > { %803 = vset.pattern.permute.xlu1 %v918_v4  ;;  %801 = vset.pattern.permute.xlu0 %v918_v4  ;;  %v434_v8 = vld [vmem:[%s1170_s4 + $0x18] sm:$0xff]  ;;  %v433_v9 = vld [vmem:[%s1170_s4 + $0x10] sm:$0xff]  ;;  %v432_v10 = vld [vmem:[%s1170_s4 + $0x8] sm:$0xff]  ;;  %vm435_vm1 = vcmask 261120   ;;  %vm401_vm2 = vcmask 130048   ;;  %s922_s17 = smov 96  }
  0x24   : > { %350 = vperm.xlu0 %801, %v339_v2   ;;  %345 = vperm.xlu1 %803, %v338_v3   ;;  %v431_v11 = vld [vmem:[%s1170_s4] sm:$0xff]  ;;  %v396_v42 = vld [vmem:[%s1166_s0 + $0x8] sm:$0xff]  ;;  %v518_v52 = vld [vmem:[%s1171_s5 + $0x18] sm:$0xff]  ;;  %s923_s20 = smov 64   ;;  %s717_s27 = sshll.u32 %s1042_s12, 4 }
  0x25   : > { %805 = vset.pattern.permute.xlu2 %v919_v5  ;;  %454 = vmatpush.msra.mxu1 %v434_v8  ;;  %v342_v17 = vld [vmem:[%s1169_s3] sm:$0xf]  ;;  %v517_v53 = vld [vmem:[%s1171_s5 + $0x10] sm:$0xff]  ;;  %v516_v55 = vld [vmem:[%s1171_s5 + $0x8] sm:$0xff]  ;;  %s594_s10 = scalar_lea.hbm %s1173_s7, %s717_s27  ;;  %s595_s11 = sshll.u32 %s1054_s29, 4  ;;  %s596_s11 = int_to_ptr.vmem [resolvable:$true] %s595_s11 }
  0x26   : > { %374 = vperm.xlu2 %805, %v339_v2   ;;  %718 = vmatpush.msra.mxu3 %v434_v8  ;;  %v364_v18 = vperm.slane %v342_v17, 1  ;;  %v353_v20 = vperm.slane %v342_v17, 0  ;;  %v377_v25 = vperm.slane %v342_v17, 2  ;;  %v390_v30 = vperm.slane %v342_v17, 3  ;;  %v395_v41 = vld [vmem:[%s1166_s0] sm:$0xff]  ;;  %s597_s23 = sshll.u32 %s594_s10, 4  ;;  %s598_s23 = int_to_ptr.hbm [resolvable:$true] %s597_s23 }
  0x27   : > { %455 = vmatpush.msra.mxu1 %v433_v9  ;;  %v1069_v12 = vld [vmem:[#allocation2] sm:$0xff]  ;;  %537 = vmatpush.msra.mxu2 %v518_v52  ;;  %s581_s12 = scalar_lea.sflag [#allocation4], %s310_s22  ;;  %s836_s9 = sshra.s32 %s598_s23, 4  ;;  %s837_s9 = int_to_ptr.hbm [resolvable:$true] %s836_s9 }
  0x28   : > { %719 = vmatpush.msra.mxu3 %v433_v9  ;;  %v1071_v13 = vld [vmem:[#allocation2 + $0x8] sm:$0xff]  ;;  %v809_v43 = vld [vmem:[%s1172_s6] ss:$0 sm:$0xff]  ;;  %s838_s13 = scalar_lea.hbm %s837_s9, 16  ;;  %s842_s18 = scalar_lea.hbm %s1173_s7, 256 }
  0x29   : > { %456 = vmatpush.msra.mxu1 %v432_v10  ;;  %538 = vmatpush.msra.mxu2 %v517_v53  ;;  %p839_p1 = scmp.ne.s32.totalorder %s837_s9, %s838_s13  ;;  %p843_p4 = scmp.lt.s32.totalorder %s837_s9, %s1173_s7 }
  0x2a   : > { %720 = vmatpush.msra.mxu3 %v432_v10  ;;  %p844_p6 = scmp.lt.s32.totalorder %s842_s18, %s838_s13 }
  0x2b   : > { %457 = vmatpush.msra.mxu1 %v431_v11  ;;  %539 = vmatpush.msra.mxu2 %v516_v55  ;;  %p840_p2 = pnand %p839_p1, %p1019_p5 }
  0x2c   : > { %802 = vset.pattern.permute.xlu0 %v920_v6  ;;  %804 = vset.pattern.permute.xlu1 %v920_v6  ;;  %p845_p8 = por %p844_p6, %p843_p4 }
  0x2d   : > { %361 = vperm.xlu0 %802, %v339_v2   ;;  %357 = vperm.xlu1 %804, %v338_v3   ;;  %p841_p3 = pneg %p840_p2 }
  0x2e   : > { %370 = vperm.xlu2 %805, %v338_v3   ;;  %721 = vmatpush.msra.mxu3 %v431_v11 }
  0x2f   : > { %703 = vmatmul.msk.f32.vlgmr.msra.gmra.mxu1 %vm435_vm1, %v1069_v12  ;;  %704 = vmatmul.msk.f32.vlgmr.msra.gmra.mxu3 %vm435_vm1, %v1071_v13  ;;  %p846_p9 = pnand %p845_p8, %p841_p3 }
  0x35   : > { %806 = vset.pattern.permute.xlu1 %v921_v7  ;;  %808 = vset.pattern.permute.xlu0 %v921_v7 }
  0x36   : > { %387 = vperm.xlu1 %806, %v339_v2   ;;  %807 = vset.pattern.permute.xlu2 %v921_v7 }
  0x37   : > { %383 = vperm.xlu2 %807, %v338_v3  }
  0x80   : > { %v375_v14 = vpop.permute.xlu2 %374 }
  0x81   : > { %v379_v32 = vmul.f32 %v377_v25, %v375_v14 }
  0x88   : > { %v371_v19 = vpop.permute.xlu2 %370 }
  0x89   : > { %v378_v33 = vmul.f32 %v377_v25, %v371_v19  ;;  %v515_v19 = vld [vmem:[%s1171_s5] sm:$0xff] }
  0x8a   : > { %540 = vmatpush.msra.mxu2 %v515_v19 }
  0x91   : > { %v384_v31 = vpop.permute.xlu2 %383 }
  0x92   : > { %v391_v35 = vmul.f32 %v390_v30, %v384_v31 }
  0x96   : > { %v346_v15 = vpop.permute.xlu1 %345  ;;  %v351_v16 = vpop.permute.xlu0 %350 }
  0x97   : > { %v354_v26 = vmul.f32 %v353_v20, %v346_v15  ;;  %v355_v27 = vmul.f32 %v353_v20, %v351_v16 }
  0x9f   : > { %v362_v21 = vpop.permute.xlu0 %361  ;;  %v358_v22 = vpop.permute.xlu1 %357 }
  0xa0   : > { %v366_v23 = vmul.f32 %v364_v18, %v362_v21  ;;  %v365_v24 = vmul.f32 %v364_v18, %v358_v22 }
  0xa2   : > { %v368_v28 = vadd.f32 %v366_v23, %v355_v27  ;;  %v367_v29 = vadd.f32 %v365_v24, %v354_v26 }
  0xa4   : > { %v381_v37 = vadd.f32 %v379_v32, %v368_v28  ;;  %v380_v38 = vadd.f32 %v378_v33, %v367_v29 }
  0xa6   : > { %v393_v40 = vadd.f32 %v391_v35, %v380_v38 }
  0xa8   : > { %v388_v34 = vpop.permute.xlu1 %387 }
  0xa9   : > { %v392_v36 = vmul.f32 %v390_v30, %v388_v34 }
  0xab   : > { %v394_v39 = vadd.f32 %v392_v36, %v381_v37 }
  0xac   : > { %v459_v45 = vpop.f32.mrf.mxu1 }
  0xad   : > { %422 = vmatpush.msra.mxu0 %v394_v39 }
  0xaf   : > { %423 = vmatpush.msra.mxu0 %v393_v40 }
  0xb0   : > { %701 = vmatmul.msk.f32.vlgmr.msra.gmra.mxu0 %vm401_vm2, %v395_v41 }
  0xb2   : > { %v462_v50 = vpop.f32.mrf.mxu3 }
  0xb8   : > { %702 = vmatmul.msk.f32.gmra.mxu0 %vm401_vm2, %v396_v42 }
 0x12d   : > { %v425_v44 = vpop.f32.mrf.mxu0 }
 0x12e   : > { %v1089_v46 = vadd.f32 %v809_v43, %v425_v44 }
 0x130   : > { %v465_v47 = vadd.f32 %v459_v45, %v1089_v46 }
 0x132   : > { %v705_v48 = vmul.f32 -1.442695, %v465_v47 }
 0x134   : > { %810 = vpow2.f32 %v705_v48 }
 0x135   : > { %v428_v49 = vpop.f32.mrf.mxu0 }
 0x136   : > { %v1092_v51 = vadd.f32 %v809_v43, %v428_v49 }
 0x138   : > { %v466_v54 = vadd.f32 %v462_v50, %v1092_v51 }
 0x13a   : > { %v811_v56 = vpop.eup %810  ;;  %v706_v57 = vmul.f32 -1.442695, %v466_v54 }
 0x13b   : > { %v473_v58 = vadd.f32 1.0, %v811_v56 }
 0x13c   : > { %812 = vpow2.f32 %v706_v57 }
 0x13d   : > { %814 = vrcp.f32 %v473_v58  ;;  %v486_v0 = vand.u32 2147483648, %v473_v58  ;;  %v484_v2 = vand.u32 2147483647, %v473_v58  ;;  %vm480_vm4 = vweird.f32 %v473_v58 }
 0x13f   : > { %v487_v5 = vor.u32 1.1754944e-38, %v486_v0  ;;  %vm485_vm6 = vcmp.eq.f32.partialorder %v484_v2, 8.507059e+37 }
 0x142   : > { %v813_v59 = vpop.eup %812 }
 0x143   : > { %v815_v60 = vpop.eup %814  ;;  %v474_v61 = vadd.f32 1.0, %v813_v59 }
 0x144   : > { %v476_v62 = vmul.f32 %v815_v60, %v473_v58  ;;  %vm481_vm3 = vweird.f32 %v815_v60 }
 0x145   : > { %816 = vrcp.f32 %v474_v61  ;;  %vm482_vm5 = vmor %vm480_vm4, %vm481_vm3  ;;  %v501_v10 = vand.u32 2147483648, %v474_v61  ;;  %v499_v14 = vand.u32 2147483647, %v474_v61  ;;  %vm495_vm8 = vweird.f32 %v474_v61 }
 0x146   : > { %v477_v63 = vsub.f32 1.0, %v476_v62 }
 0x147   : > { %v502_v16 = vor.u32 1.1754944e-38, %v501_v10  ;;  %vm500_vm10 = vcmp.eq.f32.partialorder %v499_v14, 8.507059e+37 }
 0x148   : > { %v478_v1 = vmul.f32 %v815_v60, %v477_v63 }
 0x14a   : > { %v479_v3 = vadd.f32 %v815_v60, %v478_v1 }
 0x14b   : > { %v817_v4 = vpop.eup %816 }
 0x14c   : > { %v483_v6 = vsel %vm482_vm5, %v815_v60, %v479_v3  ;;  %v491_v7 = vmul.f32 %v817_v4, %v474_v61  ;;  %vm496_vm7 = vweird.f32 %v817_v4 }
 0x14d   : > { %v488_v8 = vsel %vm485_vm6, %v487_v5, %v483_v6  ;;  %vm497_vm9 = vmor %vm495_vm8, %vm496_vm7 }
 0x14e   : > { %507 = vrot.lane.b32.xlu0 %v488_v8, %s922_s17  ;;  %v492_v9 = vsub.f32 1.0, %v491_v7  ;;  %v562_v32 = vsub.f32 1.0, %v488_v8  ;;  %v560_v34 = vmul.f32 %v488_v8, %v1069_v12 }
 0x150   : > { %v493_v11 = vmul.f32 %v817_v4, %v492_v9 }
 0x152   : > { %v494_v15 = vadd.f32 %v817_v4, %v493_v11 }
 0x154   : > { %v498_v17 = vsel %vm497_vm9, %v817_v4, %v494_v15 }
 0x155   : > { %v503_v18 = vsel %vm500_vm10, %v502_v16, %v498_v17 }
 0x156   : > { %509 = vrot.lane.b32.xlu1 %v503_v18, %s922_s17  ;;  %v563_v37 = vsub.f32 1.0, %v503_v18 }
 0x1c0   : > { %v508_v20 = vpop.permute.xlu0 %507 }
 0x1c1   : > { %v513_v21 = vmul.f32 %v508_v20, %v1069_v12  ;;  %v561_v12 = vmul.f32 %v503_v18, %v1071_v13 }
 0x1c3   : > { %707 = vmatmul.msk.f32.vlgmr.msra.gmra.mxu2 %vm435_vm1, %v513_v21 }
 0x1c8   : > { %v510_v22 = vpop.permute.xlu1 %509 }
 0x1c9   : > { %v514_v23 = vmul.f32 %v510_v22, %v1071_v13 }
 0x1cb   : > { %708 = vmatmul.msk.f32.gmra.mxu2 %vm435_vm1, %v514_v23 }
 0x246   : > { %v542_v24 = vpop.f32.mrf.mxu2 }
 0x247   : > { %550 = vrot.lane.b32.xlu2 %v542_v24, %s923_s20 }
 0x24e   : > { %v545_v25 = vpop.f32.mrf.mxu2 }
 0x24f   : > { %552 = vrot.lane.b32.xlu0 %v545_v25, %s923_s20 }
 0x2a1   : > { %v551_v26 = vpop.permute.xlu2 %550 }
 0x2a2   : > { %v556_v27 = vadd.f32 %v551_v26, %v1089_v46 }
 0x2a4   : > { %818 = vtanh.f32 %v556_v27 }
 0x2aa   : > { %v819_v28 = vpop.eup %818 }
 0x2ab   : > { %566 = vrot.lane.b32.xlu1 %v819_v28, %s923_s20 }
 0x2c1   : > { %v553_v29 = vpop.permute.xlu0 %552 }
 0x2c2   : > { %v557_v30 = vadd.f32 %v553_v29, %v1092_v51 }
 0x2c4   : > { %820 = vtanh.f32 %v557_v30 }
 0x2ca   : > { %v821_v31 = vpop.eup %820 }
 0x2cb   : > { %568 = vrot.lane.b32.xlu2 %v821_v31, %s923_s20 }
 0x31d   : > { %v567_v33 = vpop.permute.xlu1 %566 }
 0x31e   : > { %v572_v35 = vmul.f32 %v567_v33, %v562_v32 }
 0x320   : > { %v574_v36 = vadd.f32 %v572_v35, %v560_v34 }
 0x322   : > { %576 = vst.msk [vmem:[#allocation2] sm:$0xff] %vm435_vm1, %v574_v36 }
 0x323   : > { %578 = vst.msk [vmem:[%s1054_s29] sm:$0xff] %vm435_vm1, %v574_v36 }
 0x325   : > { %v569_v38 = vpop.permute.xlu2 %568 }
 0x326   : > { %v573_v39 = vmul.f32 %v569_v38, %v563_v37 }
 0x328   : > { %v575_v40 = vadd.f32 %v573_v39, %v561_v12 }
 0x32a   : > { %577 = vst.msk [vmem:[#allocation2 + $0x8] sm:$0xff] %vm435_vm1, %v575_v40 }
 0x32b   : > { %579 = vst.msk [vmem:[%s1054_s29 + $0x8] sm:$0xff] %vm435_vm1, %v575_v40 }
 0x32c   : > { %849 = shalt.err (!%p846_p9)
}
 0x32d   : > { %s924_s29 = smov 128   ;;  %s925_s22 = smov 8  }
 0x32e   : > { %722 = dma.vmem_to_hbm [thread:$0]  (%p1019_p5), %s596_s11, 256, %s598_s23, %s581_s12, %s924_s29, %s924_s29, %s925_s22  }
 0x32f PF: > { %p728_p10 = scmp.ge.s32.totalorder %s916_s8, 2  ;;  %s612_s27 = sand.u32 1, %s888_s24  }
 0x330   : > { %s613_s28 = scalar_lea.sflag [#allocation4], %s612_s27 }
 0x331   : > { %p725_p11 = pnand %p728_p10, %p1025_p7 }
 0x333   : > { %p726_p12 = pneg %p725_p11 }
 0x335   : > { %883 = dma.done.wait (%p726_p12), %s613_s28, 256  }
 0x336   : > { %885 = vsyncadd (%p726_p12), %s613_s28, 4294967040  ;;  %s20_s8 = sadd.s32 1, %s916_s8   ;;  %s1184_s27 = sld [smem:[#allocation6_spill]] }
 0x337   : > { %p17_p13 = scmp.ge.s32.totalorder %s20_s8, 18   ;;  %s1185_s28 = sld [smem:[#allocation7_spill]] }
 0x338   : > { %s1186_s29 = sld [smem:[#allocation8_spill]]  ;;  %s1188_s24 = smov %s892_s25 }
 0x339   : > { %s1187_s30 = sld [smem:[#allocation9_spill]]  ;;  %s1189_s25 = smov %s896_s26 }
 0x33a   : > { %s1190_s26 = smov %s1035_s21  ;;  %19 = sbr.rel (!%p17_p13) target bundleno = 5 (0x5), region = 90 }
 0x33f   :  { %619 = vsyncpa [#allocation4], 1 }
 0x340   :  { %621 = vsyncpa [#allocation4 + $0x1], 1 }

</bundles_post_ra>
